<compile_context>
chip_gen: v7x
topology: tpu7x:2x2x1
jax: 0.10.0
libtpu: 0.0.40
codegen_flags: <defaults>
</compile_context>

<pallas_src>
import functools

import jax
import jax.numpy as jnp
import numpy as np
from jax.experimental import pallas as pl
from jax.experimental.pallas import tpu as pltpu


# ---------------------------------------------------------------------------
# Kernel body
# ---------------------------------------------------------------------------
def _decomp_body(x_ref, halo_ref, res_ref, mean_ref, *, kernel_size, pad,
                 tile_len, channels, halo_pitch):
    """One grid step over a (bt, tile_len*C) slab.

    x_ref:    (bt, tL*C)     input tile (time*channels folded onto lanes)
    halo_ref: (bt, 2*Hp)     [left halo | right halo], each `pad` timesteps,
                             lane-padded to halo_pitch (None when pad == 0)
    res_ref / mean_ref: (bt, tL*C) outputs
    """
    k = kernel_size
    C = channels
    tL = tile_len
    W = tL * C
    Hs = pad * C
    f32 = jnp.float32
    inv_k = 1.0 / float(k)
    out_dtype = mean_ref.dtype

    def window_sum(load, width):
        # sum_{j=0..k-1} of k shifted slices, accumulated in f32.
        acc = load(0, width)
        for j in range(1, k):
            acc = acc + load(j * C, width)
        return acc

    def emit(col, width, mean_val, x_val):
        # Store mean, then res = x - stored-precision mean (so res + mean == x
        # reconstructs like the PyTorch module, also for low-precision dtypes).
        mean_q = mean_val.astype(out_dtype)
        mean_ref[:, col:col + width] = mean_q
        res_ref[:, col:col + width] = (x_val - mean_q.astype(f32)).astype(out_dtype)

    if pad > 0 and tL < 2 * pad:
        # Tiny-sequence fallback (L < kernel_size - 1): every window straddles
        # both replicate pads; build the padded series as a small VMEM value.
        xp = jnp.concatenate(
            [halo_ref[:, 0:Hs].astype(f32),
             x_ref[...].astype(f32),
             halo_ref[:, halo_pitch:halo_pitch + Hs].astype(f32)], axis=-1)
        mean = window_sum(lambda o, w: xp[:, o:o + w], W) * inv_k
        emit(0, W, mean, x_ref[...].astype(f32))
        return

    # --- interior: windows lie entirely inside the tile, read x_ref directly ---
    Wi = (tL - 2 * pad) * C
    if Wi > 0:
        mean_i = window_sum(lambda o, w: x_ref[:, o:o + w].astype(f32), Wi) * inv_k
        emit(Hs, Wi, mean_i, x_ref[:, Hs:Hs + Wi].astype(f32))

    if pad > 0:
        E = Hs  # edge output width per side (pad timesteps)
        # --- front edge: [left halo | first 2*pad timesteps of the tile] ---
        fbuf = jnp.concatenate(
            [halo_ref[:, 0:Hs].astype(f32),
             x_ref[:, 0:2 * Hs].astype(f32)], axis=-1)
        mean_f = window_sum(lambda o, w: fbuf[:, o:o + w], E) * inv_k
        emit(0, E, mean_f, x_ref[:, 0:E].astype(f32))
        # --- back edge: [last 2*pad timesteps of the tile | right halo] ---
        bbuf = jnp.concatenate(
            [x_ref[:, W - 2 * Hs:W].astype(f32),
             halo_ref[:, halo_pitch:halo_pitch + Hs].astype(f32)], axis=-1)
        mean_b = window_sum(lambda o, w: bbuf[:, o:o + w], E) * inv_k
        emit(W - E, E, mean_b, x_ref[:, W - E:W].astype(f32))


def _kernel_with_halo(x_ref, halo_ref, res_ref, mean_ref, **kw):
    _decomp_body(x_ref, halo_ref, res_ref, mean_ref, **kw)


def _kernel_no_halo(x_ref, res_ref, mean_ref, **kw):
    _decomp_body(x_ref, None, res_ref, mean_ref, **kw)


# ---------------------------------------------------------------------------
# Generation-aware tiling
# ---------------------------------------------------------------------------
def _gen_config():
    """Per-generation slab budget, grid-step preference and VMEM limit."""
    kind = ""
    try:
        kind = jax.devices()[0].device_kind.lower()
    except Exception:
        pass
    if ("v5 lite" in kind) or ("v5e" in kind) or ("v5lite" in kind):
        # 128 MiB physical VMEM but 16 MiB default scoped -> set the limit explicitly.
        return dict(slab_budget=4 << 20, min_steps=1, vmem_limit=100 << 20)
    if "v6" in kind:
        # Single TC, 128 MiB VMEM: one big tile beats many small steps.
        return dict(slab_budget=8 << 20, min_steps=1, vmem_limit=100 << 20)
    if ("v7" in kind) or ("tpu7" in kind):
        # 2 TCs, only 64 MiB VMEM/TC: prefer >= 4 steps, cap the limit at ~48 MiB.
        return dict(slab_budget=4 << 20, min_steps=4, vmem_limit=48 << 20)
    # Unknown generation: conservative (v7x-like) settings.
    return dict(slab_budget=4 << 20, min_steps=2, vmem_limit=48 << 20)


def _choose_tiles(B, L, C, pad, itemsize, cfg, tile_override=None):
    """Pick (batch_tile, time_tile).

    Legality: bt is a multiple of the dtype-aware sublane granule dividing B (or
    B itself); tL divides L and either tL == L or tL*C is a multiple of 128 (so
    the folded lane block stays (8,128)-legal and stores stay unmasked) and
    tL >= 2*pad (so edge windows only need one-sided halos).
    """
    if tile_override is not None:
        bt, tL = tile_override
        assert B % bt == 0 and L % tL == 0
        assert tL == L or ((tL * C) % 128 == 0 and (pad == 0 or tL >= 2 * pad))
        return int(bt), int(tL)

    sub = max(8, 32 // max(itemsize, 1))        # 8 for f32, 16 for bf16, 32 for int8
    bts = sorted({B} | {bt for bt in range(sub, B, sub) if B % bt == 0})
    tls = []
    for tl in range(1, L + 1):
        if L % tl:
            continue
        if tl != L:
            if (tl * C) % 128 != 0:
                continue
            if pad > 0 and tl < 2 * pad:
                continue
        tls.append(tl)

    budget = cfg["slab_budget"]
    min_steps = cfg["min_steps"]
    cands = [(bt, tl) for bt in bts for tl in tls
             if bt * tl * C * itemsize <= budget]
    if not cands:
        # Robustness fallback: nothing fits the budget (awkward B with huge L*C).
        # Take the smallest legal slab instead of the old bt=B path; the raised
        # vmem_limit_bytes gives it the best chance to compile.
        cands = [min(((bt, tl) for bt in bts for tl in tls),
                     key=lambda c: c[0] * c[1])]

    def score(c):
        bt, tl = c
        steps = (B // bt) * (L // tl)
        slab = bt * tl * C * itemsize
        # Prefer meeting the step target, then the biggest slab, then fewer
        # time tiles (less halo overhead), then bigger batch tiles.
        return (1 if steps >= min_steps else 0, slab, tl, bt)

    bt, tl = max(cands, key=score)
    return int(bt), int(tl)


def _build_halos(x, pad, tL, nT, Hp):
    """(B, nT*2*Hp) array: per time-tile [left halo | right halo], replicate-clamped."""
    B, L, C = x.shape
    Hs = pad * C
    starts = np.arange(nT) * tL
    offs = np.arange(pad)
    left_idx = np.clip(starts[:, None] - pad + offs[None, :], 0, L - 1).reshape(-1)
    right_idx = np.clip(starts[:, None] + tL + offs[None, :], 0, L - 1).reshape(-1)
    left = jnp.take(x, jnp.asarray(left_idx), axis=1).reshape(B, nT, Hs)
    right = jnp.take(x, jnp.asarray(right_idx), axis=1).reshape(B, nT, Hs)
    halo = jnp.zeros((B, nT, 2, Hp), x.dtype)
    halo = halo.at[:, :, 0, :Hs].set(left)
    halo = halo.at[:, :, 1, :Hs].set(right)
    return halo.reshape(B, nT * 2 * Hp)


# ---------------------------------------------------------------------------
# Public wrapper
# ---------------------------------------------------------------------------
def series_decomp(x, kernel_size, *, tile_override=None):
    """Pallas implementation of DLinear's series_decomp.

    Args:
      x: (B, L, C) array (batch, time, channels).
      kernel_size: odd int (as required by the original module).
      tile_override: optional (batch_tile, time_tile) for testing.
    Returns:
      (res, moving_mean), both (B, L, C).
    """
    if kernel_size < 1 or kernel_size % 2 != 1:
        raise ValueError("series_decomp requires an odd kernel_size >= 1")
    B, L, C = x.shape
    pad = (kernel_size - 1) // 2
    W = L * C
    itemsize = jnp.dtype(x.dtype).itemsize

    cfg = _gen_config()
    bt, tL = _choose_tiles(B, L, C, pad, itemsize, cfg, tile_override)
    nB, nT = B // bt, L // tL
    Wt = tL * C

    # Free layout change (for default row-major layouts): collapse the two minor
    # dims so the lane axis is dense.
    x2d = x.reshape(B, W)

    Hs = pad * C
    Hp = ((max(Hs, 1) + 63) // 64) * 64   # per-side halo pitch, lane-friendly

    inputs = [x2d]
    in_specs = [pl.BlockSpec((bt, Wt), lambda b, t: (b, t))]
    halo_bytes = 0
    if pad > 0:
        halo2d = _build_halos(x, pad, tL, nT, Hp)
        inputs.append(halo2d)
        in_specs.append(pl.BlockSpec((bt, 2 * Hp), lambda b, t: (b, t)))
        halo_bytes = halo2d.size * itemsize
        kernel = functools.partial(_kernel_with_halo, kernel_size=kernel_size,
                                   pad=pad, tile_len=tL, channels=C, halo_pitch=Hp)
    else:
        kernel = functools.partial(_kernel_no_halo, kernel_size=kernel_size,
                                   pad=pad, tile_len=tL, channels=C, halo_pitch=Hp)

    out_shapes = (
        jax.ShapeDtypeStruct((B, W), x.dtype),   # res
        jax.ShapeDtypeStruct((B, W), x.dtype),   # moving_mean
    )
    out_spec = pl.BlockSpec((bt, Wt), lambda b, t: (b, t))

    res2d, mean2d = pl.pallas_call(
        kernel,
        out_shape=out_shapes,
        grid_spec=pltpu.PrefetchScalarGridSpec(
            num_scalar_prefetch=0,
            grid=(nB, nT),
            in_specs=in_specs,
            out_specs=[out_spec, out_spec],
        ),
        compiler_params=pltpu.CompilerParams(
            dimension_semantics=("parallel", "parallel"),
            vmem_limit_bytes=cfg["vmem_limit"],
        ),
        cost_estimate=pl.CostEstimate(
            flops=(kernel_size + 1) * B * W,                    # k-1 adds + mul + sub / elem
            transcendentals=0,
            bytes_accessed=3 * B * W * itemsize + halo_bytes,   # 1 read + 2 writes (+ halos)
        ),
    )(*inputs)

    return res2d.reshape(B, L, C), mean2d.reshape(B, L, C)


# ---------------------------------------------------------------------------
# Pure-JAX reference mirroring the PyTorch module
# ---------------------------------------------------------------------------
def _reference(x, kernel_size):
    pad = (kernel_size - 1) // 2
    front = jnp.repeat(x[:, 0:1, :], pad, axis=1)
    end = jnp.repeat(x[:, -1:, :], pad, axis=1)
    xpad = jnp.concatenate([front, x, end], axis=1)
    L = x.shape[1]
    windows = jnp.stack([xpad[:, j:j + L, :] for j in range(kernel_size)], axis=0)
    mean = jnp.mean(windows, axis=0)
    return x - mean, mean


if __name__ == "__main__":
    key = jax.random.PRNGKey(0)
    # (B, L, C, kernel_size, tile_override): basic case, DLinear-like C=7,
    # forced 2x2 batch+time grid (exercises halos), kernel_size=1 degenerate,
    # and L < kernel_size-1 (tiny-sequence fallback path).
    configs = [
        (2, 16, 8, 5, None),
        (4, 24, 7, 7, None),
        (16, 32, 8, 9, (8, 16)),
        (2, 16, 8, 1, None),
        (2, 8, 8, 25, None),
    ]
    for (B, L, C, k, ovr) in configs:
        key, sub = jax.random.split(key)
        x = jax.random.normal(sub, (B, L, C), dtype=jnp.float32)

        res, mean = series_decomp(x, k, tile_override=ovr)
        res = jax.block_until_ready(res)
        mean = jax.block_until_ready(mean)

        res_ref, mean_ref = _reference(x, k)
        assert res.shape == (B, L, C) and mean.shape == (B, L, C)
        assert jnp.allclose(mean, mean_ref, atol=1e-5, rtol=1e-5), (B, L, C, k)
        assert jnp.allclose(res, res_ref, atol=1e-5, rtol=1e-5), (B, L, C, k)

    print("KERNEL_OK")
</pallas_src>

<mosaic_0001>
module attributes {stable_mosaic.version = 11 : i64} {
  func.func @_kernel_with_halo(%arg0: i32, %arg1: i32, %arg2: memref<2x128xf32, #tpu.memory_space<vmem>>, %arg3: memref<2x128xf32, #tpu.memory_space<vmem>>, %arg4: memref<2x128xf32, #tpu.memory_space<vmem>>, %arg5: memref<2x128xf32, #tpu.memory_space<vmem>>) attributes {dimension_semantics = [#tpu.dimension_semantics<parallel>, #tpu.dimension_semantics<parallel>], iteration_bounds = array<i64: 1, 1>, scalar_prefetch = 0 : i64, scratch_operands = 0 : i64, tpu.core_type = #tpu.core_type<tc>, window_params = [{transform_indices = @transform_0, window_bounds = array<i64: 2, 128>}, {transform_indices = @transform_1, window_bounds = array<i64: 2, 128>}, {transform_indices = @transform_2, window_bounds = array<i64: 2, 128>}, {transform_indices = @transform_3, window_bounds = array<i64: 2, 128>}]} {
    %c0 = arith.constant 0 : index
    %c0_0 = arith.constant 0 : index
    %0 = vector.load %arg2[%c0, %c0_0] : memref<2x128xf32, #tpu.memory_space<vmem>>, vector<2x96xf32>
    %c0_1 = arith.constant 0 : index
    %c8 = arith.constant 8 : index
    %1 = vector.load %arg2[%c0_1, %c8] : memref<2x128xf32, #tpu.memory_space<vmem>>, vector<2x96xf32>
    %2 = arith.addf %0, %1 : vector<2x96xf32>
    %c0_2 = arith.constant 0 : index
    %c16 = arith.constant 16 : index
    %3 = vector.load %arg2[%c0_2, %c16] : memref<2x128xf32, #tpu.memory_space<vmem>>, vector<2x96xf32>
    %4 = arith.addf %2, %3 : vector<2x96xf32>
    %c0_3 = arith.constant 0 : index
    %c24 = arith.constant 24 : index
    %5 = vector.load %arg2[%c0_3, %c24] : memref<2x128xf32, #tpu.memory_space<vmem>>, vector<2x96xf32>
    %6 = arith.addf %4, %5 : vector<2x96xf32>
    %c0_4 = arith.constant 0 : index
    %c32 = arith.constant 32 : index
    %7 = vector.load %arg2[%c0_4, %c32] : memref<2x128xf32, #tpu.memory_space<vmem>>, vector<2x96xf32>
    %8 = arith.addf %6, %7 : vector<2x96xf32>
    %cst = arith.constant 2.000000e-01 : f32
    %9 = vector.broadcast %cst : f32 to vector<2x96xf32>
    %10 = arith.mulf %8, %9 : vector<2x96xf32>
    %c0_5 = arith.constant 0 : index
    %c16_6 = arith.constant 16 : index
    %11 = vector.load %arg2[%c0_5, %c16_6] : memref<2x128xf32, #tpu.memory_space<vmem>>, vector<2x96xf32>
    %c0_7 = arith.constant 0 : index
    %c16_8 = arith.constant 16 : index
    %12 = vector.load %arg5[%c0_7, %c16_8] : memref<2x128xf32, #tpu.memory_space<vmem>>, vector<2x96xf32>
    tpu.vector_store %arg5[%c0_7, %c16_8], %10 {strides = array<i32>} : memref<2x128xf32, #tpu.memory_space<vmem>>, vector<2x96xf32>,
    %13 = arith.subf %11, %10 : vector<2x96xf32>
    %c0_9 = arith.constant 0 : index
    %c16_10 = arith.constant 16 : index
    %14 = vector.load %arg4[%c0_9, %c16_10] : memref<2x128xf32, #tpu.memory_space<vmem>>, vector<2x96xf32>
    tpu.vector_store %arg4[%c0_9, %c16_10], %13 {strides = array<i32>} : memref<2x128xf32, #tpu.memory_space<vmem>>, vector<2x96xf32>,
    %c0_11 = arith.constant 0 : index
    %c0_12 = arith.constant 0 : index
    %15 = vector.load %arg3[%c0_11, %c0_12] : memref<2x128xf32, #tpu.memory_space<vmem>>, vector<2x16xf32>
    %c0_13 = arith.constant 0 : index
    %c0_14 = arith.constant 0 : index
    %16 = vector.load %arg2[%c0_13, %c0_14] : memref<2x128xf32, #tpu.memory_space<vmem>>, vector<2x32xf32>
    %17 = tpu.concatenate %15, %16 in 1 : vector<2x16xf32>, vector<2x32xf32> -> vector<2x48xf32>
    %18 = vector.extract_strided_slice %17 {offsets = [0, 0], sizes = [2, 16], strides = [1, 1]} : vector<2x48xf32> to vector<2x16xf32>
    %19 = vector.extract_strided_slice %17 {offsets = [0, 8], sizes = [2, 16], strides = [1, 1]} : vector<2x48xf32> to vector<2x16xf32>
    %20 = arith.addf %18, %19 : vector<2x16xf32>
    %21 = vector.extract_strided_slice %17 {offsets = [0, 16], sizes = [2, 16], strides = [1, 1]} : vector<2x48xf32> to vector<2x16xf32>
    %22 = arith.addf %20, %21 : vector<2x16xf32>
    %23 = vector.extract_strided_slice %17 {offsets = [0, 24], sizes = [2, 16], strides = [1, 1]} : vector<2x48xf32> to vector<2x16xf32>
    %24 = arith.addf %22, %23 : vector<2x16xf32>
    %25 = vector.extract_strided_slice %17 {offsets = [0, 32], sizes = [2, 16], strides = [1, 1]} : vector<2x48xf32> to vector<2x16xf32>
    %26 = arith.addf %24, %25 : vector<2x16xf32>
    %cst_15 = arith.constant 2.000000e-01 : f32
    %27 = vector.broadcast %cst_15 : f32 to vector<2x16xf32>
    %28 = arith.mulf %26, %27 : vector<2x16xf32>
    %c0_16 = arith.constant 0 : index
    %c0_17 = arith.constant 0 : index
    %29 = vector.load %arg2[%c0_16, %c0_17] : memref<2x128xf32, #tpu.memory_space<vmem>>, vector<2x16xf32>
    %c0_18 = arith.constant 0 : index
    %c0_19 = arith.constant 0 : index
    %30 = vector.load %arg5[%c0_18, %c0_19] : memref<2x128xf32, #tpu.memory_space<vmem>>, vector<2x16xf32>
    tpu.vector_store %arg5[%c0_18, %c0_19], %28 {strides = array<i32>} : memref<2x128xf32, #tpu.memory_space<vmem>>, vector<2x16xf32>,
    %31 = arith.subf %29, %28 : vector<2x16xf32>
    %c0_20 = arith.constant 0 : index
    %c0_21 = arith.constant 0 : index
    %32 = vector.load %arg4[%c0_20, %c0_21] : memref<2x128xf32, #tpu.memory_space<vmem>>, vector<2x16xf32>
    tpu.vector_store %arg4[%c0_20, %c0_21], %31 {strides = array<i32>} : memref<2x128xf32, #tpu.memory_space<vmem>>, vector<2x16xf32>,
    %c0_22 = arith.constant 0 : index
    %c96 = arith.constant 96 : index
    %33 = vector.load %arg2[%c0_22, %c96] : memref<2x128xf32, #tpu.memory_space<vmem>>, vector<2x32xf32>
    %c0_23 = arith.constant 0 : index
    %c64 = arith.constant 64 : index
    %34 = vector.load %arg3[%c0_23, %c64] : memref<2x128xf32, #tpu.memory_space<vmem>>, vector<2x16xf32>
    %35 = tpu.concatenate %33, %34 in 1 : vector<2x32xf32>, vector<2x16xf32> -> vector<2x48xf32>
    %36 = vector.extract_strided_slice %35 {offsets = [0, 0], sizes = [2, 16], strides = [1, 1]} : vector<2x48xf32> to vector<2x16xf32>
    %37 = vector.extract_strided_slice %35 {offsets = [0, 8], sizes = [2, 16], strides = [1, 1]} : vector<2x48xf32> to vector<2x16xf32>
    %38 = arith.addf %36, %37 : vector<2x16xf32>
    %39 = vector.extract_strided_slice %35 {offsets = [0, 16], sizes = [2, 16], strides = [1, 1]} : vector<2x48xf32> to vector<2x16xf32>
    %40 = arith.addf %38, %39 : vector<2x16xf32>
    %41 = vector.extract_strided_slice %35 {offsets = [0, 24], sizes = [2, 16], strides = [1, 1]} : vector<2x48xf32> to vector<2x16xf32>
    %42 = arith.addf %40, %41 : vector<2x16xf32>
    %43 = vector.extract_strided_slice %35 {offsets = [0, 32], sizes = [2, 16], strides = [1, 1]} : vector<2x48xf32> to vector<2x16xf32>
    %44 = arith.addf %42, %43 : vector<2x16xf32>
    %cst_24 = arith.constant 2.000000e-01 : f32
    %45 = vector.broadcast %cst_24 : f32 to vector<2x16xf32>
    %46 = arith.mulf %44, %45 : vector<2x16xf32>
    %c0_25 = arith.constant 0 : index
    %c112 = arith.constant 112 : index
    %47 = vector.load %arg2[%c0_25, %c112] : memref<2x128xf32, #tpu.memory_space<vmem>>, vector<2x16xf32>
    %c0_26 = arith.constant 0 : index
    %c112_27 = arith.constant 112 : index
    %48 = vector.load %arg5[%c0_26, %c112_27] : memref<2x128xf32, #tpu.memory_space<vmem>>, vector<2x16xf32>
    tpu.vector_store %arg5[%c0_26, %c112_27], %46 {strides = array<i32>} : memref<2x128xf32, #tpu.memory_space<vmem>>, vector<2x16xf32>,
    %49 = arith.subf %47, %46 : vector<2x16xf32>
    %c0_28 = arith.constant 0 : index
    %c112_29 = arith.constant 112 : index
    %50 = vector.load %arg4[%c0_28, %c112_29] : memref<2x128xf32, #tpu.memory_space<vmem>>, vector<2x16xf32>
    tpu.vector_store %arg4[%c0_28, %c112_29], %49 {strides = array<i32>} : memref<2x128xf32, #tpu.memory_space<vmem>>, vector<2x16xf32>,
    return
  }
  func.func @transform_0(%arg0: i32, %arg1: i32) -> (i32, i32) {
    %c0_i32 = arith.constant 0 : i32
    return %arg0, %arg1 : i32, i32
  }
  func.func @transform_1(%arg0: i32, %arg1: i32) -> (i32, i32) {
    %c0_i32 = arith.constant 0 : i32
    return %arg0, %arg1 : i32, i32
  }
  func.func @transform_2(%arg0: i32, %arg1: i32) -> (i32, i32) {
    %c0_i32 = arith.constant 0 : i32
    return %arg0, %arg1 : i32, i32
  }
  func.func @transform_3(%arg0: i32, %arg1: i32) -> (i32, i32) {
    %c0_i32 = arith.constant 0 : i32
    return %arg0, %arg1 : i32, i32
  }
}

</mosaic_0001>

<bundles_post_ra>
// kernel: tpu_custom_call.1
= control target key start
LH: loop header
LB: loop body
LE: loop exit
PB: predicated region body
PF: predicated region fallthrough
CT: control target
= control target key end

     0   :  { %9 = vsyncpa [#allocation3], 0  ;;  %s330_s0 = inlined_call_operand.hbm [shape: f32[2,128], index: 0, kind: input, shape index: {}]   ;;  %s331_s1 = inlined_call_operand.vmem [shape: f32[2,128], index: 1, kind: input, shape index: {}]   ;;  %s332_s2 = inlined_call_operand.hbm [shape: f32[2,128], index: 2, kind: output, shape index: {0}]   ;;  %s333_s3 = inlined_call_operand.hbm [shape: f32[2,128], index: 3, kind: output, shape index: {1}]  }
   0x1   :  { %10 = vsyncpa [#allocation4], 0 }
   0x2   :  { %11 = vsyncpa [#allocation7], 0  ;;  %s232_s12 = smov [#allocation2]   ;;  %s160_s16 = scalar_lea.hbm %s330_s0, 32 }
   0x3   :  { %s18_s13 = sshll.u32 %s232_s12, 4  ;;  %p161_p0 = scmp.ne.s32.totalorder %s330_s0, %s160_s16  ;;  %s19_s13 = int_to_ptr.vmem [resolvable:$true] %s18_s13 }
   0x4   :  { %p164_p1 = scmp.lt.u32.totalorder %s160_s16, %s330_s0 }
   0x6   :  { %p166_p2 = pnand %p164_p1, %p161_p0 }
   0x8   :  { %169 = shalt.err (!%p166_p2)
}
   0x9   :  { %s170_s21 = scalar_lea.vmem %s19_s13, 32  ;;  %p175_p4 = scmp.lt.s32.totalorder %s19_s13, %s19_s13 }
   0xa   :  { %p171_p3 = scmp.ne.s32.totalorder %s19_s13, %s170_s21  ;;  %p176_p5 = scmp.lt.s32.totalorder %s170_s21, %s170_s21 }
   0xc   :  { %p177_p6 = por %p176_p5, %p175_p4 }
   0xe   :  { %p178_p7 = pnand %p177_p6, %p171_p3 }
  0x10   :  { %181 = shalt.err (!%p178_p7)
}
  0x11   :  { %21 = dma.hbm_to_vmem [thread:$0]  %s330_s0, 32, %s19_s13, [#allocation3]  }
  0x12   :  { %226 = dma.done.wait [#allocation3], 32  }
  0x13   :  { %227 = vsyncadd [#allocation3], 4294967264  ;;  %v273_v0 = vld [vmem:[#allocation2] sm:$0x3]  ;;  %s233_s24 = smov 32   ;;  %s234_s25 = smov 120  }
  0x14   :  { %v275_v1 = vld [vmem:[#allocation2] sm:$0x3]  ;;  %87 = vrot.lane.b32.xlu0 %v273_v0, %s233_s24  ;;  %s235_s0 = smov 96   ;;  %s236_s28 = smov 16   ;;  %vm94_vm0 = vcmask 261120   ;;  %vm60_vm1 = vcmask 130048  }
  0x15   :  { %29 = vrot.lane.b32.xlu1 %v275_v1, %s234_s25  ;;  %v85_v2 = vld [vmem:[%s331_s1] sm:$0x3]  ;;  %s237_s29 = smov 112   ;;  %s238_s30 = smov 104   ;;  %vm50_vm2 = vcmask 910464   ;;  %vm80_vm3 = vcmask 123904  }
  0x16   :  { %v283_v3 = vld [vmem:[#allocation2] sm:$0x3]  ;;  %vm118_vm4 = vcmask 1042304   ;;  %s240_s7 = smov [#allocation5]  }
  0x17   :  { %v54_v9 = vld [vmem:[%s331_s1] sm:$0x3]  ;;  %s239_s1 = smov [#allocation6]   ;;  %s128_s8 = sshll.u32 %s240_s7, 4  ;;  %s129_s8 = int_to_ptr.vmem [resolvable:$true] %s128_s8 }
  0x18   :  { %91 = vrot.lane.b32.xlu0 %v85_v2, %s235_s0  ;;  %s138_s6 = sshll.u32 %s239_s1, 4  ;;  %s139_s6 = int_to_ptr.vmem [resolvable:$true] %s138_s6 }
  0x19   :  { %57 = vrot.lane.b32.xlu1 %v283_v3, %s236_s28  ;;  %s182_s9 = scalar_lea.vmem %s139_s6, 32  ;;  %p187_p9 = scmp.lt.s32.totalorder %s139_s6, %s139_s6 }
  0x1a   :  { %p183_p8 = scmp.ne.s32.totalorder %s139_s6, %s182_s9  ;;  %p188_p10 = scmp.lt.s32.totalorder %s182_s9, %s182_s9 }
  0x1c   :  { %33 = vrot.lane.b32.xlu0 %v275_v1, %s237_s29  ;;  %p189_p11 = por %p188_p10, %p187_p9 }
  0x1e   :  { %p190_p12 = pnand %p189_p11, %p183_p8 }
  0x20   :  { %37 = vrot.lane.b32.xlu0 %v275_v1, %s238_s30 }
  0x24   :  { %41 = vrot.lane.b32.xlu0 %v275_v1, %s235_s0 }
  0x86   :  { %v88_v4 = vpop.permute.xlu0 %87 }
  0x87   :  { %v30_v5 = vpop.permute.xlu1 %29 }
  0x88   :  { %v32_v8 = vadd.f32 %v30_v5, %v275_v1 }
  0x8a   :  { %v92_v6 = vpop.permute.xlu0 %91 }
  0x8b   :  { %v95_v7 = vsel %vm94_vm0, %v88_v4, %v92_v6  ;;  %v58_v10 = vpop.permute.xlu1 %57 }
  0x8c   :  { %109 = vrot.lane.b32.xlu0 %v95_v7, %s235_s0  ;;  %97 = vrot.lane.b32.xlu1 %v95_v7, %s234_s25  ;;  %v61_v12 = vsel %vm60_vm1, %v54_v9, %v58_v10 }
  0x8e   :  { %v34_v11 = vpop.permute.xlu0 %33 }
  0x8f   :  { %v36_v13 = vadd.f32 %v34_v11, %v32_v8 }
  0x90   :  { %101 = vrot.lane.b32.xlu1 %v95_v7, %s237_s29  ;;  %67 = vrot.lane.b32.xlu0 %v61_v12, %s237_s29 }
  0x92   :  { %v38_v14 = vpop.permute.xlu0 %37 }
  0x93   :  { %v40_v15 = vadd.f32 %v38_v14, %v36_v13 }
  0x94   :  { %105 = vrot.lane.b32.xlu1 %v95_v7, %s238_s30  ;;  %75 = vrot.lane.b32.xlu0 %v61_v12, %s235_s0 }
  0x96   :  { %v42_v16 = vpop.permute.xlu0 %41 }
  0x97   :  { %v44_v17 = vadd.f32 %v42_v16, %v40_v15 }
  0x98   :  { %63 = vrot.lane.b32.xlu1 %v61_v12, %s234_s25 }
  0x99   :  { %v45_v18 = vmul.f32 0.2, %v44_v17 }
  0x9c   :  { %71 = vrot.lane.b32.xlu1 %v61_v12, %s238_s30 }
  0xa0   :  { %47 = vrot.lane.b32.xlu1 %v45_v18, %s236_s28 }
  0xfe   :  { %v98_v19 = vpop.permute.xlu1 %97  ;;  %v110_v22 = vpop.permute.xlu0 %109 }
  0xff   :  { %v100_v21 = vadd.f32 %v98_v19, %v95_v7 }
 0x102   :  { %v102_v20 = vpop.permute.xlu1 %101  ;;  %v68_v26 = vpop.permute.xlu0 %67 }
 0x103   :  { %v104_v23 = vadd.f32 %v102_v20, %v100_v21 }
 0x106   :  { %v106_v24 = vpop.permute.xlu1 %105  ;;  %v76_v33 = vpop.permute.xlu0 %75 }
 0x107   :  { %v108_v25 = vadd.f32 %v106_v24, %v104_v23 }
 0x109   :  { %v112_v27 = vadd.f32 %v110_v22, %v108_v25 }
 0x10a   :  { %v64_v28 = vpop.permute.xlu1 %63 }
 0x10b   :  { %v113_v29 = vmul.f32 0.2, %v112_v27  ;;  %v66_v30 = vadd.f32 %v64_v28, %v61_v12 }
 0x10d   :  { %v70_v31 = vadd.f32 %v68_v26, %v66_v30  ;;  %115 = vrot.lane.b32.xlu0 %v113_v29, %s237_s29 }
 0x10e   :  { %v72_v32 = vpop.permute.xlu1 %71 }
 0x10f   :  { %v74_v34 = vadd.f32 %v72_v32, %v70_v31 }
 0x111   :  { %v78_v35 = vadd.f32 %v76_v33, %v74_v34 }
 0x112   :  { %v48_v36 = vpop.permute.xlu1 %47 }
 0x113   :  { %v79_v37 = vmul.f32 0.2, %v78_v35  ;;  %51 = vst.msk [vmem:[#allocation6] sm:$0x3] %vm50_vm2, %v48_v36  ;;  %v52_v38 = vsub.f32 %v275_v1, %v48_v36 }
 0x115   :  { %v82_v39 = vsub.f32 %v283_v3, %v79_v37  ;;  %53 = vst.msk [vmem:[#allocation5] sm:$0x3] %vm50_vm2, %v52_v38 }
 0x116   :  { %81 = vst.msk [vmem:[#allocation6] sm:$0x3] %vm80_vm3, %v79_v37 }
 0x117   :  { %83 = vst.msk [vmem:[#allocation5] sm:$0x3] %vm80_vm3, %v82_v39 }
 0x17f   :  { %v116_v40 = vpop.permute.xlu0 %115 }
 0x180   :  { %v120_v41 = vsub.f32 %v273_v0, %v116_v40  ;;  %119 = vst.msk [vmem:[#allocation6] sm:$0x3] %vm118_vm4, %v116_v40 }
 0x181   :  { %193 = shalt.err (!%p190_p12)
}
 0x182   :  { %s194_s12 = scalar_lea.hbm %s333_s3, 32 }
 0x183   :  { %p195_p13 = scmp.ne.s32.totalorder %s333_s3, %s194_s12  ;;  %p198_p0 = scmp.lt.u32.totalorder %s194_s12, %s333_s3 }
 0x185   :  { %p200_p1 = pnand %p198_p0, %p195_p13 }
 0x187   :  { %203 = shalt.err (!%p200_p1)
}
 0x188   :  { %141 = dma.vmem_to_hbm [thread:$0]  %s139_s6, 32, %s333_s3, [#allocation7]   ;;  %121 = vst.msk [vmem:[#allocation5] sm:$0x3] %vm118_vm4, %v120_v41 }
 0x189   :  { %s204_s19 = scalar_lea.vmem %s129_s8, 32  ;;  %p209_p3 = scmp.lt.s32.totalorder %s129_s8, %s129_s8 }
 0x18a   :  { %p205_p2 = scmp.ne.s32.totalorder %s129_s8, %s204_s19  ;;  %p210_p4 = scmp.lt.s32.totalorder %s204_s19, %s204_s19 }
 0x18c   :  { %p211_p5 = por %p210_p4, %p209_p3 }
 0x18e   :  { %p212_p6 = pnand %p211_p5, %p205_p2 }
 0x190   :  { %215 = shalt.err (!%p212_p6)
}
 0x191   :  { %s216_s22 = scalar_lea.hbm %s332_s2, 32 }
 0x192   :  { %p217_p7 = scmp.ne.s32.totalorder %s332_s2, %s216_s22  ;;  %p220_p8 = scmp.lt.u32.totalorder %s216_s22, %s332_s2 }
 0x194   :  { %p222_p9 = pnand %p220_p8, %p217_p7 }
 0x196   :  { %225 = shalt.err (!%p222_p9)
}
 0x197   :  { %131 = dma.vmem_to_hbm [thread:$0]  %s129_s8, 32, %s332_s2, [#allocation4]  }
 0x198   :  { %228 = dma.done.wait [#allocation4], 32  }
 0x199   :  { %229 = vsyncadd [#allocation4], 4294967264 }
 0x19a   :  { %230 = dma.done.wait [#allocation7], 32  }
 0x19b   :  { %231 = vsyncadd [#allocation7], 4294967264 }
 0x19c   :  { %148 = vsyncpa [#allocation3], 1 }
 0x19d   :  { %149 = vsyncpa [#allocation4], 1 }
 0x19e   :  { %150 = vsyncpa [#allocation7], 1 }

</bundles_post_ra>
